<compile_context>
chip_gen: v7x
topology: tpu7x:2x2x1
jax: 0.10.0
libtpu: 0.0.40
codegen_flags: <defaults>
</compile_context>

<pallas_src>
import jax
import jax.numpy as jnp
from jax import lax
from jax.experimental import pallas as pl
from jax.experimental.pallas import tpu as pltpu

NEGATIVE_RATIO = 3.0
EPS = 1e-6

LANES = 512          # lane-dense block width (multiple of 128 -> unmasked stores)
MAX_TILE_ROWS = 512  # 512 x 512 x 4B = 1 MiB per f32 block; fits v7x VMEM budget


def _round_up(x, m):
    return ((x + m - 1) // m) * m


def _bce_stats_kernel(pred_ref, gt_ref, mask_ref,
                      neg_loss_ref, pos_sum_ref, pos_cnt_ref, neg_cnt_ref):
    """One (b1, col_tile, b2) cell: BCE + pos/neg masking + per-tile partial reductions."""
    pred = pred_ref[0]                                  # (tile_r, LANES) f32
    gt = gt_ref[0].astype(jnp.float32)                  # bf16 -> f32 (exact for {0,1})
    m = mask_ref[0].astype(jnp.float32)

    # torch.nn.functional.binary_cross_entropy(reduction='none'); log clamped at -100.
    # (Two logs kept — the single-log trick is only valid for strictly binary gt.)
    log_p = jnp.maximum(jnp.log(pred), -100.0)
    log_1mp = jnp.maximum(jnp.log(1.0 - pred), -100.0)
    loss = -(gt * log_p + (1.0 - gt) * log_1mp)

    # .byte() cast emulation (non-negative inputs -> truncation == floor).
    pos = jnp.floor(gt * m)
    neg = jnp.floor((1.0 - gt) * m)

    neg_loss_ref[0, 0] = loss * neg
    # Per-tile partials (each tile has <= 512*512 < 2^24 elements, so the f32
    # count partials are exact integers).
    pos_sum_ref[0] = jnp.sum(loss * pos, keepdims=True)
    pos_cnt_ref[0] = jnp.sum(pos, keepdims=True)
    neg_cnt_ref[0] = jnp.sum(neg, keepdims=True)


def _topk_partial_kernel(start_ref, sorted_ref, part_ref):
    """Per-tile sum of ascending-sorted values whose flat index >= start (= total - k)."""
    t = pl.program_id(0)
    tile_rows, tile_lanes = sorted_ref.shape[1], sorted_ref.shape[2]
    base = t * (tile_rows * tile_lanes)                 # scalar flat offset of this tile
    local = (lax.broadcasted_iota(jnp.int32, (tile_rows, tile_lanes), 0) * tile_lanes
             + lax.broadcasted_iota(jnp.int32, (tile_rows, tile_lanes), 1))
    keep = (base + local) >= start_ref[0]
    part_ref[0] = jnp.sum(jnp.where(keep, sorted_ref[0], 0.0), keepdims=True)


def balance_cross_entropy_loss(pred, gt, mask,
                               negative_ratio=NEGATIVE_RATIO, eps=EPS):
    assert pred.ndim == 4 and pred.shape[1] == 1, "pred must be (N, 1, H, W)"
    assert gt.shape == pred.shape, "gt must have the same shape as pred"
    assert mask.ndim == 3 and mask.shape[-2:] == pred.shape[-2:], "mask must be (N, H, W)"

    b1 = pred.shape[0]           # batch axis of pred/gt
    b2 = mask.shape[0]           # batch axis of mask (broadcast against pred's channel-1)
    hw = pred.shape[2] * pred.shape[3]

    # Tiling plan: each image flattened to (r_pad, LANES); col tiles of tile_r rows.
    r = pl.cdiv(hw, LANES)
    c_tiles = pl.cdiv(r, MAX_TILE_ROWS)
    tile_r = _round_up(pl.cdiv(r, c_tiles), 16)         # multiple of 16 for bf16 packing
    r_pad = c_tiles * tile_r

    def to_tiles(x, dtype):
        x2 = x.reshape(x.shape[0], -1).astype(dtype)
        padded = r_pad * LANES
        if padded != x2.shape[1]:
            # Zero padding is inert: padded pos/neg masks and losses are exactly 0.
            x2 = jnp.pad(x2, ((0, 0), (0, padded - x2.shape[1])))
        return x2.reshape(x.shape[0], r_pad, LANES)

    # pred stays f32 (log precision); gt/mask are {0,1} maps -> bf16 halves their HBM reads.
    pred_t = to_tiles(pred, jnp.float32)
    gt_t = to_tiles(gt, jnp.bfloat16)
    mask_t = to_tiles(mask, jnp.bfloat16)

    g = b1 * c_tiles * b2

    # Broadcast expressed via index maps; b2 (the broadcast axis of pred/gt) is the
    # innermost grid axis so their unchanged blocks are not re-DMA'd across it.
    def pred_map(i, c, j): return (i, c, 0)
    def mask_map(i, c, j): return (j, c, 0)
    def negl_map(i, c, j): return (i, j, c, 0)
    def part_map(i, c, j): return ((i * c_tiles + c) * b2 + j, 0, 0)

    neg_loss, pos_sum_p, pos_cnt_p, neg_cnt_p = pl.pallas_call(
        _bce_stats_kernel,
        grid=(b1, c_tiles, b2),
        in_specs=[
            pl.BlockSpec((1, tile_r, LANES), pred_map),
            pl.BlockSpec((1, tile_r, LANES), pred_map),
            pl.BlockSpec((1, tile_r, LANES), mask_map),
        ],
        out_specs=(
            pl.BlockSpec((1, 1, tile_r, LANES), negl_map),
            pl.BlockSpec((1, 1, 1), part_map),
            pl.BlockSpec((1, 1, 1), part_map),
            pl.BlockSpec((1, 1, 1), part_map),
        ),
        out_shape=(
            jax.ShapeDtypeStruct((b1, b2, r_pad, LANES), jnp.float32),
            jax.ShapeDtypeStruct((g, 1, 1), jnp.float32),
            jax.ShapeDtypeStruct((g, 1, 1), jnp.float32),
            jax.ShapeDtypeStruct((g, 1, 1), jnp.float32),
        ),
        compiler_params=pltpu.CompilerParams(
            dimension_semantics=("parallel", "arbitrary", "arbitrary"),
            vmem_limit_bytes=32 * 1024 * 1024),
    )(pred_t, gt_t, mask_t)

    # Exact integer counts: per-tile partials are exact f32 integers -> cast then int-sum.
    pos_count = jnp.sum(pos_cnt_p.astype(jnp.int32))
    neg_total = jnp.sum(neg_cnt_p.astype(jnp.int32))
    k = jnp.minimum(
        neg_total,
        (pos_count.astype(jnp.float32) * negative_ratio).astype(jnp.int32))
    pos_sum = jnp.sum(pos_sum_p)

    # TODO(synk): torch.topk has no native Pallas TPU primitive; an ascending XLA sort is
    # used (no [::-1] reverse copy) and only the dynamic-k selection + sum is in-kernel.
    # A histogram / threshold-search top-k-sum would remove the O(n log n) sort entirely.
    m_pad = b1 * b2 * r_pad * LANES
    srt = jnp.sort(neg_loss.reshape(-1))                 # ascending
    t_tiles = m_pad // (tile_r * LANES)
    srt3 = srt.reshape(t_tiles, tile_r, LANES)
    start = (jnp.asarray(m_pad, jnp.int32) - k).reshape(1)   # top-k == flat idx >= start

    topk_parts = pl.pallas_call(
        _topk_partial_kernel,
        grid_spec=pltpu.PrefetchScalarGridSpec(
            num_scalar_prefetch=1,
            grid=(t_tiles,),
            in_specs=[pl.BlockSpec((1, tile_r, LANES), lambda t, s: (t, 0, 0))],
            out_specs=pl.BlockSpec((1, 1, 1), lambda t, s: (t, 0, 0)),
        ),
        out_shape=jax.ShapeDtypeStruct((t_tiles, 1, 1), jnp.float32),
        compiler_params=pltpu.CompilerParams(
            dimension_semantics=("parallel",),
            vmem_limit_bytes=32 * 1024 * 1024),
    )(start, srt3)

    topk_sum = jnp.sum(topk_parts)
    denom = pos_count.astype(jnp.float32) + k.astype(jnp.float32) + eps
    return (pos_sum + topk_sum) / denom


def _reference(pred, gt, mask, negative_ratio=NEGATIVE_RATIO, eps=EPS):
    """Pure-JAX mirror of the PyTorch forward (for verification)."""
    pred = pred.astype(jnp.float32)
    gt = gt.astype(jnp.float32)
    mask = mask.astype(jnp.float32)
    positive = jnp.floor(gt * mask)                      # (N,N,H,W) after broadcasting
    negative = jnp.floor((1.0 - gt) * mask)
    pos_count = jnp.sum(positive).astype(jnp.int32)
    neg_count = jnp.minimum(
        jnp.sum(negative).astype(jnp.int32),
        (pos_count.astype(jnp.float32) * negative_ratio).astype(jnp.int32))
    log_p = jnp.maximum(jnp.log(pred), -100.0)
    log_1mp = jnp.maximum(jnp.log(1.0 - pred), -100.0)
    loss = -(gt * log_p + (1.0 - gt) * log_1mp)
    pos_loss = loss * positive
    neg_loss = (loss * negative).reshape(-1)
    srt = jnp.sort(neg_loss)[::-1]
    idx = jnp.arange(srt.shape[0])
    topk_sum = jnp.sum(jnp.where(idx < neg_count, srt, 0.0))
    return (jnp.sum(pos_loss) + topk_sum) / (
        pos_count.astype(jnp.float32) + neg_count.astype(jnp.float32) + eps)


if __name__ == "__main__":
    key = jax.random.PRNGKey(0)
    k1, k2, k3 = jax.random.split(key, 3)
    N, H, W = 2, 16, 16

    pred = jax.nn.sigmoid(jax.random.normal(k1, (N, 1, H, W), jnp.float32))
    gt = (jax.random.uniform(k2, (N, 1, H, W)) > 0.5).astype(jnp.float32)
    mask = (jax.random.uniform(k3, (N, H, W)) > 0.3).astype(jnp.float32)

    loss_fn = jax.jit(balance_cross_entropy_loss)
    loss = jax.block_until_ready(loss_fn(pred, gt, mask))

    ref = jax.block_until_ready(_reference(pred, gt, mask))
    assert jnp.isfinite(loss), "loss is not finite"
    assert jnp.allclose(loss, ref, rtol=1e-4, atol=1e-5), (loss, ref)

    print("KERNEL_OK")
</pallas_src>

<mosaic_0001>
module attributes {stable_mosaic.version = 11 : i64} {
  func.func @_bce_stats_kernel(%arg0: i32, %arg1: i32, %arg2: i32, %arg3: memref<1x16x512xf32, #tpu.memory_space<vmem>>, %arg4: memref<1x16x512xbf16, #tpu.memory_space<vmem>>, %arg5: memref<1x16x512xbf16, #tpu.memory_space<vmem>>, %arg6: memref<1x1x16x512xf32, #tpu.memory_space<vmem>>, %arg7: memref<1x1x1xf32, #tpu.memory_space<vmem>>, %arg8: memref<1x1x1xf32, #tpu.memory_space<vmem>>, %arg9: memref<1x1x1xf32, #tpu.memory_space<vmem>>) attributes {dimension_semantics = [#tpu.dimension_semantics<parallel>, #tpu.dimension_semantics<arbitrary>, #tpu.dimension_semantics<arbitrary>], iteration_bounds = array<i64: 2, 1, 2>, scalar_prefetch = 0 : i64, scratch_operands = 0 : i64, tpu.core_type = #tpu.core_type<tc>, window_params = [{transform_indices = @transform_0, window_bounds = array<i64: 1, 16, 512>}, {transform_indices = @transform_1, window_bounds = array<i64: 1, 16, 512>}, {transform_indices = @transform_2, window_bounds = array<i64: 1, 16, 512>}, {transform_indices = @transform_3, window_bounds = array<i64: 1, 1, 16, 512>}, {transform_indices = @transform_4, window_bounds = array<i64: 1, 1, 1>}, {transform_indices = @transform_5, window_bounds = array<i64: 1, 1, 1>}, {transform_indices = @transform_6, window_bounds = array<i64: 1, 1, 1>}]} {
    %c0 = arith.constant 0 : index
    %c0_0 = arith.constant 0 : index
    %c0_1 = arith.constant 0 : index
    %0 = vector.load %arg3[%c0, %c0_0, %c0_1] : memref<1x16x512xf32, #tpu.memory_space<vmem>>, vector<1x16x512xf32>
    %1 = vector.shape_cast %0 : vector<1x16x512xf32> to vector<16x512xf32>
    %c0_2 = arith.constant 0 : index
    %c0_3 = arith.constant 0 : index
    %c0_4 = arith.constant 0 : index
    %2 = vector.load %arg4[%c0_2, %c0_3, %c0_4] : memref<1x16x512xbf16, #tpu.memory_space<vmem>>, vector<1x16x512xbf16>
    %3 = vector.shape_cast %2 : vector<1x16x512xbf16> to vector<16x512xbf16>
    %4 = arith.extf %3 : vector<16x512xbf16> to vector<16x512xf32>
    %c0_5 = arith.constant 0 : index
    %c0_6 = arith.constant 0 : index
    %c0_7 = arith.constant 0 : index
    %5 = vector.load %arg5[%c0_5, %c0_6, %c0_7] : memref<1x16x512xbf16, #tpu.memory_space<vmem>>, vector<1x16x512xbf16>
    %6 = vector.shape_cast %5 : vector<1x16x512xbf16> to vector<16x512xbf16>
    %7 = arith.extf %6 : vector<16x512xbf16> to vector<16x512xf32>
    %8 = math.log %1 : vector<16x512xf32>
    %cst = arith.constant -1.000000e+02 : f32
    %9 = vector.broadcast %cst : f32 to vector<16x512xf32>
    %10 = arith.maximumf %8, %9 : vector<16x512xf32>
    %cst_8 = arith.constant 1.000000e+00 : f32
    %11 = vector.broadcast %cst_8 : f32 to vector<16x512xf32>
    %12 = arith.subf %11, %1 : vector<16x512xf32>
    %13 = math.log %12 : vector<16x512xf32>
    %cst_9 = arith.constant -1.000000e+02 : f32
    %14 = vector.broadcast %cst_9 : f32 to vector<16x512xf32>
    %15 = arith.maximumf %13, %14 : vector<16x512xf32>
    %16 = arith.mulf %4, %10 : vector<16x512xf32>
    %cst_10 = arith.constant 1.000000e+00 : f32
    %17 = vector.broadcast %cst_10 : f32 to vector<16x512xf32>
    %18 = arith.subf %17, %4 : vector<16x512xf32>
    %19 = arith.mulf %18, %15 : vector<16x512xf32>
    %20 = arith.addf %16, %19 : vector<16x512xf32>
    %cst_11 = arith.constant 0.000000e+00 : f32
    %21 = vector.broadcast %cst_11 : f32 to vector<16x512xf32>
    %22 = arith.subf %21, %20 : vector<16x512xf32>
    %23 = arith.mulf %4, %7 : vector<16x512xf32>
    %24 = math.floor %23 : vector<16x512xf32>
    %cst_12 = arith.constant 1.000000e+00 : f32
    %25 = vector.broadcast %cst_12 : f32 to vector<16x512xf32>
    %26 = arith.subf %25, %4 : vector<16x512xf32>
    %27 = arith.mulf %26, %7 : vector<16x512xf32>
    %28 = math.floor %27 : vector<16x512xf32>
    %29 = arith.mulf %22, %28 : vector<16x512xf32>
    %c0_13 = arith.constant 0 : index
    %c0_14 = arith.constant 0 : index
    %c0_15 = arith.constant 0 : index
    %c0_16 = arith.constant 0 : index
    %30 = vector.load %arg6[%c0_13, %c0_14, %c0_15, %c0_16] : memref<1x1x16x512xf32, #tpu.memory_space<vmem>>, vector<1x1x16x512xf32>
    %31 = vector.shape_cast %30 : vector<1x1x16x512xf32> to vector<16x512xf32>
    %32 = vector.shape_cast %29 : vector<16x512xf32> to vector<1x1x16x512xf32>
    tpu.vector_store %arg6[%c0_13, %c0_14, %c0_15, %c0_16], %32 {strides = array<i32>} : memref<1x1x16x512xf32, #tpu.memory_space<vmem>>, vector<1x1x16x512xf32>,
    %33 = arith.mulf %22, %24 : vector<16x512xf32>
    %34 = vector.shape_cast %33 : vector<16x512xf32> to vector<1x16x512xf32>
    %cst_17 = arith.constant dense<0.000000e+00> : vector<1xf32>
    %35 = vector.multi_reduction <add>, %34, %cst_17 [1, 2] : vector<1x16x512xf32> to vector<1xf32>
    %36 = vector.shape_cast %35 : vector<1xf32> to vector<1x1x1xf32>
    %37 = vector.extract %36[0, 0, 0] : f32 from vector<1x1x1xf32>
    %38 = vector.broadcast %37 : f32 to vector<1x1xf32>
    %c0_18 = arith.constant 0 : index
    %c0_19 = arith.constant 0 : index
    %c0_20 = arith.constant 0 : index
    %39 = vector.load %arg7[%c0_18, %c0_19, %c0_20] : memref<1x1x1xf32, #tpu.memory_space<vmem>>, vector<1x1x1xf32>
    %40 = vector.shape_cast %39 : vector<1x1x1xf32> to vector<1x1xf32>
    %41 = vector.shape_cast %38 : vector<1x1xf32> to vector<1x1x1xf32>
    tpu.vector_store %arg7[%c0_18, %c0_19, %c0_20], %41 {strides = array<i32>} : memref<1x1x1xf32, #tpu.memory_space<vmem>>, vector<1x1x1xf32>,
    %42 = vector.shape_cast %24 : vector<16x512xf32> to vector<1x16x512xf32>
    %cst_21 = arith.constant dense<0.000000e+00> : vector<1xf32>
    %43 = vector.multi_reduction <add>, %42, %cst_21 [1, 2] : vector<1x16x512xf32> to vector<1xf32>
    %44 = vector.shape_cast %43 : vector<1xf32> to vector<1x1x1xf32>
    %45 = vector.extract %44[0, 0, 0] : f32 from vector<1x1x1xf32>
    %46 = vector.broadcast %45 : f32 to vector<1x1xf32>
    %c0_22 = arith.constant 0 : index
    %c0_23 = arith.constant 0 : index
    %c0_24 = arith.constant 0 : index
    %47 = vector.load %arg8[%c0_22, %c0_23, %c0_24] : memref<1x1x1xf32, #tpu.memory_space<vmem>>, vector<1x1x1xf32>
    %48 = vector.shape_cast %47 : vector<1x1x1xf32> to vector<1x1xf32>
    %49 = vector.shape_cast %46 : vector<1x1xf32> to vector<1x1x1xf32>
    tpu.vector_store %arg8[%c0_22, %c0_23, %c0_24], %49 {strides = array<i32>} : memref<1x1x1xf32, #tpu.memory_space<vmem>>, vector<1x1x1xf32>,
    %50 = vector.shape_cast %28 : vector<16x512xf32> to vector<1x16x512xf32>
    %cst_25 = arith.constant dense<0.000000e+00> : vector<1xf32>
    %51 = vector.multi_reduction <add>, %50, %cst_25 [1, 2] : vector<1x16x512xf32> to vector<1xf32>
    %52 = vector.shape_cast %51 : vector<1xf32> to vector<1x1x1xf32>
    %53 = vector.extract %52[0, 0, 0] : f32 from vector<1x1x1xf32>
    %54 = vector.broadcast %53 : f32 to vector<1x1xf32>
    %c0_26 = arith.constant 0 : index
    %c0_27 = arith.constant 0 : index
    %c0_28 = arith.constant 0 : index
    %55 = vector.load %arg9[%c0_26, %c0_27, %c0_28] : memref<1x1x1xf32, #tpu.memory_space<vmem>>, vector<1x1x1xf32>
    %56 = vector.shape_cast %55 : vector<1x1x1xf32> to vector<1x1xf32>
    %57 = vector.shape_cast %54 : vector<1x1xf32> to vector<1x1x1xf32>
    tpu.vector_store %arg9[%c0_26, %c0_27, %c0_28], %57 {strides = array<i32>} : memref<1x1x1xf32, #tpu.memory_space<vmem>>, vector<1x1x1xf32>,
    return
  }
  func.func @transform_0(%arg0: i32, %arg1: i32, %arg2: i32) -> (i32, i32, i32) {
    %c0_i32 = arith.constant 0 : i32
    %c0_i32_0 = arith.constant 0 : i32
    return %arg0, %arg1, %c0_i32 : i32, i32, i32
  }
  func.func @transform_1(%arg0: i32, %arg1: i32, %arg2: i32) -> (i32, i32, i32) {
    %c0_i32 = arith.constant 0 : i32
    %c0_i32_0 = arith.constant 0 : i32
    return %arg0, %arg1, %c0_i32 : i32, i32, i32
  }
  func.func @transform_2(%arg0: i32, %arg1: i32, %arg2: i32) -> (i32, i32, i32) {
    %c0_i32 = arith.constant 0 : i32
    %c0_i32_0 = arith.constant 0 : i32
    return %arg2, %arg1, %c0_i32 : i32, i32, i32
  }
  func.func @transform_3(%arg0: i32, %arg1: i32, %arg2: i32) -> (i32, i32, i32, i32) {
    %c0_i32 = arith.constant 0 : i32
    %c0_i32_0 = arith.constant 0 : i32
    return %arg0, %arg2, %arg1, %c0_i32 : i32, i32, i32, i32
  }
  func.func @transform_4(%arg0: i32, %arg1: i32, %arg2: i32) -> (i32, i32, i32) {
    %c1_i32 = arith.constant 1 : i32
    %0 = arith.muli %arg0, %c1_i32 : i32
    %1 = arith.addi %0, %arg1 : i32
    %c2_i32 = arith.constant 2 : i32
    %2 = arith.muli %1, %c2_i32 : i32
    %3 = arith.addi %2, %arg2 : i32
    %c0_i32 = arith.constant 0 : i32
    %c0_i32_0 = arith.constant 0 : i32
    %c0_i32_1 = arith.constant 0 : i32
    return %3, %c0_i32, %c0_i32_0 : i32, i32, i32
  }
  func.func @transform_5(%arg0: i32, %arg1: i32, %arg2: i32) -> (i32, i32, i32) {
    %c1_i32 = arith.constant 1 : i32
    %0 = arith.muli %arg0, %c1_i32 : i32
    %1 = arith.addi %0, %arg1 : i32
    %c2_i32 = arith.constant 2 : i32
    %2 = arith.muli %1, %c2_i32 : i32
    %3 = arith.addi %2, %arg2 : i32
    %c0_i32 = arith.constant 0 : i32
    %c0_i32_0 = arith.constant 0 : i32
    %c0_i32_1 = arith.constant 0 : i32
    return %3, %c0_i32, %c0_i32_0 : i32, i32, i32
  }
  func.func @transform_6(%arg0: i32, %arg1: i32, %arg2: i32) -> (i32, i32, i32) {
    %c1_i32 = arith.constant 1 : i32
    %0 = arith.muli %arg0, %c1_i32 : i32
    %1 = arith.addi %0, %arg1 : i32
    %c2_i32 = arith.constant 2 : i32
    %2 = arith.muli %1, %c2_i32 : i32
    %3 = arith.addi %2, %arg2 : i32
    %c0_i32 = arith.constant 0 : i32
    %c0_i32_0 = arith.constant 0 : i32
    %c0_i32_1 = arith.constant 0 : i32
    return %3, %c0_i32, %c0_i32_0 : i32, i32, i32
  }
}

module attributes {stable_mosaic.version = 11 : i64} {
  func.func @_topk_partial_kernel(%arg0: i32, %arg1: memref<1xi32, #tpu.memory_space<smem>>, %arg2: memref<1x16x512xf32, #tpu.memory_space<vmem>>, %arg3: memref<1x1x1xf32, #tpu.memory_space<vmem>>) attributes {dimension_semantics = [#tpu.dimension_semantics<parallel>], iteration_bounds = array<i64: 4>, scalar_prefetch = 1 : i64, scratch_operands = 0 : i64, tpu.core_type = #tpu.core_type<tc>, window_params = [{transform_indices = @transform_0, window_bounds = array<i64: 1, 16, 512>}, {transform_indices = @transform_1, window_bounds = array<i64: 1, 1, 1>}]} {
    %c8192_i32 = arith.constant 8192 : i32
    %0 = arith.muli %arg0, %c8192_i32 : i32
    %1 = tpu.iota {dimensions = array<i32: 0>} : vector<16x512xi32>
    %c512_i32 = arith.constant 512 : i32
    %2 = vector.broadcast %c512_i32 : i32 to vector<16x512xi32>
    %3 = arith.muli %1, %2 : vector<16x512xi32>
    %4 = tpu.iota {dimensions = array<i32: 1>} : vector<16x512xi32>
    %5 = arith.addi %3, %4 : vector<16x512xi32>
    %6 = vector.broadcast %0 : i32 to vector<16x512xi32>
    %7 = arith.addi %6, %5 : vector<16x512xi32>
    %c0 = arith.constant 0 : index
    %8 = memref.load %arg1[%c0] : memref<1xi32, #tpu.memory_space<smem>>
    %9 = vector.broadcast %8 : i32 to vector<16x512xi32>
    %10 = arith.cmpi sge, %7, %9 : vector<16x512xi32>
    %c0_0 = arith.constant 0 : index
    %c0_1 = arith.constant 0 : index
    %c0_2 = arith.constant 0 : index
    %11 = vector.load %arg2[%c0_0, %c0_1, %c0_2] : memref<1x16x512xf32, #tpu.memory_space<vmem>>, vector<1x16x512xf32>
    %12 = vector.shape_cast %11 : vector<1x16x512xf32> to vector<16x512xf32>
    %cst = arith.constant 0.000000e+00 : f32
    %13 = vector.broadcast %cst : f32 to vector<16x512xf32>
    %14 = arith.select %10, %12, %13 : vector<16x512xi1>, vector<16x512xf32>
    %15 = vector.shape_cast %14 : vector<16x512xf32> to vector<1x16x512xf32>
    %cst_3 = arith.constant dense<0.000000e+00> : vector<1xf32>
    %16 = vector.multi_reduction <add>, %15, %cst_3 [1, 2] : vector<1x16x512xf32> to vector<1xf32>
    %17 = vector.shape_cast %16 : vector<1xf32> to vector<1x1x1xf32>
    %18 = vector.extract %17[0, 0, 0] : f32 from vector<1x1x1xf32>
    %19 = vector.broadcast %18 : f32 to vector<1x1xf32>
    %c0_4 = arith.constant 0 : index
    %c0_5 = arith.constant 0 : index
    %c0_6 = arith.constant 0 : index
    %20 = vector.load %arg3[%c0_4, %c0_5, %c0_6] : memref<1x1x1xf32, #tpu.memory_space<vmem>>, vector<1x1x1xf32>
    %21 = vector.shape_cast %20 : vector<1x1x1xf32> to vector<1x1xf32>
    %22 = vector.shape_cast %19 : vector<1x1xf32> to vector<1x1x1xf32>
    tpu.vector_store %arg3[%c0_4, %c0_5, %c0_6], %22 {strides = array<i32>} : memref<1x1x1xf32, #tpu.memory_space<vmem>>, vector<1x1x1xf32>,
    return
  }
  func.func @transform_0(%arg0: i32, %arg1: memref<1xi32, #tpu.memory_space<smem>>) -> (i32, i32, i32) {
    %c0_i32 = arith.constant 0 : i32
    %c0_i32_0 = arith.constant 0 : i32
    %c0_i32_1 = arith.constant 0 : i32
    return %arg0, %c0_i32, %c0_i32_0 : i32, i32, i32
  }
  func.func @transform_1(%arg0: i32, %arg1: memref<1xi32, #tpu.memory_space<smem>>) -> (i32, i32, i32) {
    %c0_i32 = arith.constant 0 : i32
    %c0_i32_0 = arith.constant 0 : i32
    %c0_i32_1 = arith.constant 0 : i32
    return %arg0, %c0_i32, %c0_i32_0 : i32, i32, i32
  }
}

</mosaic_0001>

<bundles_post_ra>
// kernel: balance_cross_entropy_loss.3
= control target key start
LH: loop header
LB: loop body
LE: loop exit
PB: predicated region body
PF: predicated region fallthrough
CT: control target
= control target key end

     0   :  { %s282_s11 = smov 0   ;;  %s313_s0 = inlined_call_operand.<no memory space> [shape: s32[1], index: 0, kind: input, shape index: {}]   ;;  %s314_s1 = inlined_call_operand.vmem [shape: f32[4,16,512], index: 1, kind: input, shape index: {}]   ;;  %s315_s2 = inlined_call_operand.vmem [shape: f32[4,1,1], index: 2, kind: output, shape index: {}]  }
   0x1   :  { %7 = sst [smem:[#allocation3]] %s313_s0 }
   0x2 LB: > { %s235_s12 = sadd.s32 4294967295, %s262_s11   ;;  %p239_p0 = scmp.ge.s32.totalorder %s262_s11, 1  ;;  %s262_s11 = sphi %s282_s11, %s13_s11  }
   0x3   : > { %p89_p1 = scmp.lt.s32.totalorder %s262_s11, 5 }
   0x5   : > { %p90_p2 = pnand %p239_p0, %p89_p1 }
   0x6   : > { %p107_p3 = scmp.lt.s32.totalorder (!%p90_p2), %s235_s12, 3  ;;  %v116_v0 = vlaneseq (!%p90_p2)  ;;  %s242_s13 = sshll.u32 (!%p90_p2), %s235_s12, 13  ;;  %vm186_vm8 = vcmask (!%p90_p2), 0  }
   0x7   : > { %93 = sbr.rel (%p90_p2) target bundleno = 239 (0xef), region = 24  ;;  %s143_s14 = sld [smem:[#allocation3]] (!%p90_p2)  ;;  %v134_v8 = vstv (!%p90_p2), %s242_s13 }
   0x8   : > { %v117_v1 = vshrl.u32 (!%p90_p2), %v116_v0, 7  ;;  %v122_v2 = vand.u32 (!%p90_p2), 127, %v116_v0 }
   0xa   : > { %v118_v3 = vadd.s32 (!%p90_p2), 8, %v117_v1  ;;  %v119_v4 = vmul.u32 (!%p90_p2), 512, %v117_v1  ;;  %v123_v5 = vadd.s32 (!%p90_p2), 128, %v122_v2  ;;  %v124_v6 = vadd.s32 (!%p90_p2), 256, %v122_v2 }
   0xb   : > { %v125_v7 = vadd.s32 (!%p90_p2), 384, %v122_v2 }
   0xc   : > { %v120_v9 = vmul.u32 (!%p90_p2), 512, %v118_v3  ;;  %v126_v10 = vadd.s32 (!%p90_p2), %v122_v2, %v119_v4  ;;  %v127_v11 = vadd.s32 (!%p90_p2), %v123_v5, %v119_v4  ;;  %v128_v12 = vadd.s32 (!%p90_p2), %v124_v6, %v119_v4 }
   0xd   : > { %v129_v13 = vadd.s32 (!%p90_p2), %v125_v7, %v119_v4  ;;  %v144_v16 = vstv (!%p90_p2), %s143_s14 }
   0xe   : > { %s317_s12 = smov (!%p107_p3, %s235_s12), 3  ;;  %v130_v14 = vadd.s32 %v122_v2, %v120_v9  ;;  %v131_v15 = vadd.s32 %v123_v5, %v120_v9  ;;  %v135_v17 = vadd.s32 %v134_v8, %v126_v10  ;;  %v136_v18 = vadd.s32 %v134_v8, %v127_v11 }
   0xf   : > { %s245_s0 = sshll.u32 %s317_s12, 6  ;;  %v137_v19 = vadd.s32 %v134_v8, %v128_v12  ;;  %v138_v20 = vadd.s32 %v134_v8, %v129_v13  ;;  %v132_v21 = vadd.s32 %v124_v6, %v120_v9  ;;  %v133_v26 = vadd.s32 %v125_v7, %v120_v9  ;;  %s114_s20 = scalar_lea.vmem %s315_s2, %s317_s12 }
  0x10   : > { %s296_s17 = scalar_lea.vmem %s314_s1, %s245_s0  ;;  %v139_v24 = vadd.s32 %v134_v8, %v130_v14  ;;  %vm145_vm0 = vcmp.ge.s32.totalorder %v135_v17, %v144_v16  ;;  %vm146_vm1 = vcmp.ge.s32.totalorder %v136_v18, %v144_v16  ;;  %v140_v27 = vadd.s32 %v134_v8, %v131_v15 }
  0x11   : > { %v153_v22 = vld [vmem:[%s296_s17] sm:$0xff]  ;;  %v154_v23 = vld [vmem:[%s296_s17 + $0x8] sm:$0xff]  ;;  %vm147_vm2 = vcmp.ge.s32.totalorder %v137_v19, %v144_v16  ;;  %v155_v25 = vld [vmem:[%s296_s17 + $0x10] sm:$0xff]  ;;  %vm148_vm3 = vcmp.ge.s32.totalorder %v138_v20, %v144_v16  ;;  %v141_v32 = vadd.s32 %v134_v8, %v132_v21  ;;  %v142_v36 = vadd.s32 %v134_v8, %v133_v26 }
  0x12   : > { %v156_v28 = vld [vmem:[%s296_s17 + $0x18] sm:$0xff]  ;;  %v161_v29 = vsel %vm145_vm0, %v153_v22, 0.0  ;;  %v162_v30 = vsel %vm146_vm1, %v154_v23, 0.0  ;;  %v163_v31 = vsel %vm147_vm2, %v155_v25, 0.0  ;;  %vm149_vm4 = vcmp.ge.s32.totalorder %v139_v24, %v144_v16  ;;  %v157_v33 = vld [vmem:[%s296_s17 + $0x20] sm:$0xff]  ;;  %v158_v37 = vld [vmem:[%s296_s17 + $0x28] sm:$0xff] }
  0x13   : > { %v169_v34 = vadd.f32 %v162_v30, %v161_v29  ;;  %v164_v35 = vsel %vm148_vm3, %v156_v28, 0.0  ;;  %vm150_vm5 = vcmp.ge.s32.totalorder %v140_v27, %v144_v16  ;;  %v165_v39 = vsel %vm149_vm4, %v157_v33, 0.0  ;;  %v159_v40 = vld [vmem:[%s296_s17 + $0x30] sm:$0xff]  ;;  %v160_v43 = vld [vmem:[%s296_s17 + $0x38] sm:$0xff] }
  0x14   : > { %vm151_vm6 = vcmp.ge.s32.totalorder %v141_v32, %v144_v16  ;;  %v166_v42 = vsel %vm150_vm5, %v158_v37, 0.0  ;;  %vm152_vm7 = vcmp.ge.s32.totalorder %v142_v36, %v144_v16 }
  0x15   : > { %v170_v38 = vadd.f32 %v169_v34, %v163_v31  ;;  %v167_v45 = vsel %vm151_vm6, %v159_v40, 0.0  ;;  %v168_v47 = vsel %vm152_vm7, %v160_v43, 0.0 }
  0x17   : > { %v171_v41 = vadd.f32 %v170_v38, %v164_v35 }
  0x19   : > { %v172_v44 = vadd.f32 %v171_v41, %v165_v39 }
  0x1b   : > { %v173_v46 = vadd.f32 %v172_v44, %v166_v42 }
  0x1d   : > { %v174_v48 = vadd.f32 %v173_v46, %v167_v45 }
  0x1f   : > { %v175_v49 = vadd.f32 %v174_v48, %v168_v47 }
  0x21   : > { %176 = vadd.xlane.f32.xlu0 %v175_v49 }
  0xae   : > { %v177_v50 = vpop.xlane.xlu0 %176 }
  0xaf   : > { %v178_v51 = vrot.slane %v177_v50, 4 }
  0xb1   : > { %v179_v52 = vadd.f32 %v178_v51, %v177_v50 }
  0xb3   : > { %v180_v53 = vrot.slane %v179_v52, 2 }
  0xb5   : > { %v181_v54 = vadd.f32 %v180_v53, %v179_v52 }
  0xb7   : > { %v182_v55 = vrot.slane %v181_v54, 1 }
  0xb9   : > { %v183_v56 = vadd.f32 %v182_v55, %v181_v54 }
  0xbb   : > { %246 = vpush %v183_v56 }
  0xec   : > { %s247_s21 = spop %246 }
  0xed   : > { %v185_v57 = vstv %s247_s21 }
  0xee   : > { %187 = vst.msk [vmem:[%s114_s20] sm:$0x1] %vm186_vm8, %v185_v57 }
  0xef PF: > { %s13_s11 = sadd.s32 1, %s262_s11  }
  0xf0   : > { %p10_p4 = scmp.ge.s32.totalorder %s13_s11, 6  }
  0xf2   :  { %12 = sbr.rel (!%p10_p4) target bundleno = 2 (0x2), region = 54 }

// kernel: balance_cross_entropy_loss.2
= control target key start
LH: loop header
LB: loop body
LE: loop exit
PB: predicated region body
PF: predicated region fallthrough
CT: control target
= control target key end

     0   :  { %s1143_s21 = smov 0   ;;  %s1145_s22 = smov 0   ;;  %s1471_s0 = inlined_call_operand.vmem [shape: f32[2,16,512], index: 0, kind: input, shape index: {}]   ;;  %s1472_s1 = inlined_call_operand.vmem [shape: bf16[2,16,512], index: 1, kind: input, shape index: {}]   ;;  %s1473_s2 = inlined_call_operand.vmem [shape: bf16[2,16,512], index: 2, kind: input, shape index: {}]   ;;  %s1474_s3 = inlined_call_operand.vmem [shape: f32[2,2,16,512], index: 3, kind: output, shape index: {0}]   ;;  %s1475_s4 = inlined_call_operand.vmem [shape: f32[4,1,1], index: 4, kind: output, shape index: {1}]   ;;  %s1476_s5 = inlined_call_operand.vmem [shape: f32[4,1,1], index: 5, kind: output, shape index: {2}]   ;;  %s1477_s6 = inlined_call_operand.vmem [shape: f32[4,1,1], index: 6, kind: output, shape index: {3}]  }
   0x1   :  { %s1147_s23 = smov 0   ;;  %s1149_s24 = smov 0  }
   0x2   :  { %s1151_s25 = smov 0  }
   0x3 LB: > { %s29_s26 = sadd.s32 1, %s1098_s23  ;;  %s36_s27 = sadd.s32 1, %s1102_s24  ;;  %s1106_s25 = sphi %s1151_s25, %s17_s25   ;;  %s1102_s24 = sphi %s1149_s24, %s1501_s24   ;;  %s1098_s23 = sphi %s1147_s23, %s1500_s23   ;;  %s1094_s22 = sphi %s1145_s22, %s1499_s22   ;;  %s1090_s21 = sphi %s1143_s21, %s1498_s21  }
   0x4   : > { %p30_p0 = scmp.ge.s32.totalorder %s29_s26, 2  ;;  %p972_p1 = scmp.ge.s32.totalorder %s1106_s25, 1 }
   0x5   : > { %p304_p2 = scmp.lt.s32.totalorder %s1106_s25, 5 }
   0x6   : > { %s1503_s26 = smov (%p30_p0, %s29_s26), 0  ;;  %s1505_s27 = smov (!%p30_p0, %s36_s27), %s1102_s24 }
   0x7   : > { %p305_p3 = pnand %p972_p1, %p304_p2  ;;  %p38_p4 = scmp.ge.s32.totalorder %s1505_s27, 2 }
   0x8   : > { %p387_p5 = scmp.lt.s32.totalorder (!%p305_p3), %s1094_s22, 1  ;;  %p409_p6 = scmp.lt.s32.totalorder (!%p305_p3), %s1090_s21, 1  ;;  %vm662_vm0 = vcmask (!%p305_p3), 0  }
   0x9   : > { %s1507_s27 = smov (%p38_p4, %s1505_s27), 0  ;;  %308 = sbr.rel (%p305_p3) target bundleno = 289 (0x121), region = 32 }
   0xa   : > { %s982_s8 = sshll.u32 (!%p305_p3), %s1094_s22, 1 }
  0x10   : > { %s1180_s28 = scalar_select %p387_p5, %s1094_s22, 1 }
  0x11   : > { %s1183_s29 = scalar_select %p409_p6, %s1090_s21, 1 }
  0x12   : > { %s988_s30 = sshll.u32 %s1180_s28, 5  ;;  %s987_s14 = sshll.u32 %s1180_s28, 6 }
  0x13   : > { %s406_s9 = scalar_lea.vmem %s1472_s1, %s988_s30  ;;  %s989_s10 = sshll.u32 %s1183_s29, 5 }
  0x14   : > { %s417_s13 = scalar_lea.vmem %s1473_s2, %s989_s10  ;;  %v469_v0 = vld [vmem:[%s406_s9] sm:$0xff]  ;;  %v470_v1 = vld [vmem:[%s406_s9 + $0x8] sm:$0xff]  ;;  %v471_v2 = vld [vmem:[%s406_s9 + $0x10] sm:$0xff]  ;;  %s1254_s17 = scalar_lea.vmem %s1471_s0, %s987_s14 }
  0x15   : > { %v1193_v3 = vunpack.c.l.bf16 %v469_v0  ;;  %v1195_v4 = vunpack.c.h.bf16 %v469_v0  ;;  %v1197_v5 = vunpack.c.l.bf16 %v470_v1  ;;  %v1199_v6 = vunpack.c.h.bf16 %v470_v1  ;;  %v1201_v7 = vld [vmem:[%s417_s13] sm:$0xff]  ;;  %v1203_v8 = vld [vmem:[%s417_s13 + $0x8] sm:$0xff]  ;;  %v1207_v10 = vld [vmem:[%s417_s13 + $0x10] sm:$0xff]  ;;  %s979_s18 = sshll.u32 %s1183_s29, 3  ;;  %s980_s19 = sshll.u32 %s1180_s28, 4 }
  0x16   : > { %v1205_v9 = vunpack.c.l.bf16 %v471_v2  ;;  %v472_v11 = vld [vmem:[%s406_s9 + $0x18] sm:$0xff]  ;;  %v485_v12 = vunpack.c.l.bf16 %v1201_v7  ;;  %v486_v13 = vunpack.c.h.bf16 %v1201_v7  ;;  %v487_v14 = vunpack.c.l.bf16 %v1203_v8  ;;  %v461_v39 = vld [vmem:[%s1254_s17] sm:$0xff]  ;;  %v462_v43 = vld [vmem:[%s1254_s17 + $0x8] sm:$0xff]  ;;  %s1373_s20 = sadd.s32 %s980_s19, %s979_s18  ;;  %s436_s9 = sadd.s32 %s1090_s21, %s982_s8 }
  0x17   : > { %v488_v15 = vunpack.c.h.bf16 %v1203_v8  ;;  %v1213_v16 = vunpack.c.h.bf16 %v471_v2  ;;  %v489_v17 = vunpack.c.l.bf16 %v1207_v10  ;;  %v1217_v18 = vld [vmem:[%s417_s13 + $0x18] sm:$0xff]  ;;  %v557_v19 = vsub.f32 1.0, %v1193_v3  ;;  %v463_v45 = vld [vmem:[%s1254_s17 + $0x10] sm:$0xff]  ;;  %v465_v51 = vld [vmem:[%s1254_s17 + $0x20] sm:$0xff]  ;;  %s981_s28 = sshll.u32 %s1373_s20, 3  ;;  %p437_p7 = scmp.lt.s32.totalorder %s436_s9, 3 }
  0x18   : > { %v558_v20 = vsub.f32 1.0, %v1195_v4  ;;  %v559_v21 = vsub.f32 1.0, %v1197_v5  ;;  %v560_v22 = vsub.f32 1.0, %v1199_v6  ;;  %v1223_v23 = vunpack.c.l.bf16 %v472_v11  ;;  %v464_v49 = vld [vmem:[%s1254_s17 + $0x18] sm:$0xff]  ;;  %v466_v54 = vld [vmem:[%s1254_s17 + $0x28] sm:$0xff]  ;;  %v467_v56 = vld [vmem:[%s1254_s17 + $0x30] sm:$0xff]  ;;  %s1393_s7 = scalar_lea.vmem %s1474_s3, %s981_s28 }
  0x19   : > { %v490_v24 = vunpack.c.h.bf16 %v1207_v10  ;;  %v561_v25 = vsub.f32 1.0, %v1205_v9  ;;  %v1231_v26 = vmul.f32 %v557_v19, %v485_v12  ;;  %v1256_v30 = vunpack.c.h.bf16 %v472_v11  ;;  %v468_v60 = vld [vmem:[%s1254_s17 + $0x38] sm:$0xff]  ;;  %s1509_s9 = smov (!%p437_p7, %s436_s9), 3 }
  0x1a   : > { %v1237_v27 = vmul.f32 %v558_v20, %v486_v13  ;;  %v1243_v28 = vmul.f32 %v559_v21, %v487_v14  ;;  %v1249_v29 = vmul.f32 %v560_v22, %v488_v15  ;;  %v491_v31 = vunpack.c.l.bf16 %v1217_v18  ;;  %s439_s12 = scalar_lea.vmem %s1475_s4, %s1509_s9  ;;  %s448_s16 = scalar_lea.vmem %s1476_s5, %s1509_s9 }
  0x1b   : > { %v562_v32 = vsub.f32 1.0, %v1213_v16  ;;  %v1264_v33 = vmul.f32 %v561_v25, %v489_v17  ;;  %v613_v34 = vfloor.f32 %v1231_v26  ;;  %v1480_v37 = vunpack.c.h.bf16 %v1217_v18  ;;  %s457_s22 = scalar_lea.vmem %s1477_s6, %s1509_s9 }
  0x1c   : > { %v614_v35 = vfloor.f32 %v1237_v27  ;;  %v615_v36 = vfloor.f32 %v1243_v28  ;;  %v563_v38 = vsub.f32 1.0, %v1223_v23  ;;  %v1485_v41 = vfloor.f32 %v1249_v29 }
  0x1d   : > { %v1276_v40 = vmul.f32 %v562_v32, %v490_v24  ;;  %1036 = vlog2.f32 %v461_v39  ;;  %v564_v44 = vsub.f32 1.0, %v1256_v30  ;;  %v1483_v47 = vfloor.f32 %v1264_v33 }
  0x1e   : > { %v682_v42 = vadd.f32 %v614_v35, %v613_v34  ;;  %1038 = vlog2.f32 %v462_v43  ;;  %v1290_v46 = vmul.f32 %v563_v38, %v491_v31  ;;  %v517_v55 = vsub.f32 1.0, %v461_v39 }
  0x1f   : > { %1040 = vlog2.f32 %v463_v45  ;;  %v1300_v50 = vmul.f32 %v564_v44, %v1480_v37  ;;  %v1481_v52 = vfloor.f32 %v1276_v40  ;;  %v518_v57 = vsub.f32 1.0, %v462_v43 }
  0x20   : > { %v683_v48 = vadd.f32 %v682_v42, %v615_v36  ;;  %1042 = vlog2.f32 %v464_v49  ;;  %v1479_v58 = vfloor.f32 %v1290_v46  ;;  %v519_v61 = vsub.f32 1.0, %v463_v45 }
  0x21   : > { %1044 = vlog2.f32 %v465_v51  ;;  %v520_v62 = vsub.f32 1.0, %v464_v49  ;;  %v1478_v63 = vfloor.f32 %v1300_v50  ;;  %v521_v1 = vsub.f32 1.0, %v465_v51 }
  0x22   : > { %v684_v53 = vadd.f32 %v683_v48, %v1485_v41  ;;  %1046 = vlog2.f32 %v466_v54  ;;  %v522_v2 = vsub.f32 1.0, %v466_v54  ;;  %v1318_v11 = vmul.f32 %v485_v12, %v1193_v3 }
  0x23   : > { %1048 = vlog2.f32 %v467_v56  ;;  %v1323_v39 = vmul.f32 %v486_v13, %v1195_v4  ;;  %v523_v45 = vsub.f32 1.0, %v467_v56  ;;  %v524_v49 = vsub.f32 1.0, %v468_v60 }
  0x24   : > { %v685_v59 = vadd.f32 %v684_v53, %v1483_v47  ;;  %1050 = vlog2.f32 %v468_v60  ;;  %v1330_v51 = vmul.f32 %v487_v14, %v1197_v5  ;;  %v597_v56 = vfloor.f32 %v1318_v11 }
  0x25   : > { %1052 = vlog2.f32 %v517_v55  ;;  %v1339_v14 = vmul.f32 %v488_v15, %v1199_v6  ;;  %v1487_v27 = vfloor.f32 %v1323_v39  ;;  %v1488_v28 = vfloor.f32 %v1264_v33 }
  0x26   : > { %v686_v0 = vadd.f32 %v685_v59, %v1481_v52  ;;  %1054 = vlog2.f32 %v518_v57  ;;  %v1484_v57 = vfloor.f32 %v1323_v39  ;;  %v1489_v11 = vfloor.f32 %v1330_v51 }
  0x27   : > { %v1037_v42 = vpop.eup %1036  ;;  %1056 = vlog2.f32 %v519_v61  ;;  %v1344_v61 = vmul.f32 %v489_v17, %v1205_v9 }
  0x28   : > { %v687_v43 = vadd.f32 %v686_v0, %v1479_v58  ;;  %v1039_v48 = vpop.eup %1038  ;;  %1058 = vlog2.f32 %v520_v62  ;;  %v494_v13 = vmul.f32 0.6931472, %v1037_v42  ;;  %v664_v8 = vadd.f32 %v1484_v57, %v597_v56 }
  0x29   : > { %v1041_v12 = vpop.eup %1040  ;;  %v496_v53 = vmul.f32 0.6931472, %v1039_v48  ;;  %1060 = vlog2.f32 %v521_v1  ;;  %v1349_v1 = vmul.f32 %v490_v24, %v1213_v16 }
  0x2a   : > { %v688_v7 = vadd.f32 %v687_v43, %v1478_v63  ;;  %v1043_v54 = vpop.eup %1042  ;;  %v498_v55 = vmul.f32 0.6931472, %v1041_v12  ;;  %1062 = vlog2.f32 %v522_v2  ;;  %v509_v42 = vmax.f32 %v494_v13, -100.0 }
  0x2b   : > { %v1045_v59 = vpop.eup %1044  ;;  %v500_v60 = vmul.f32 0.6931472, %v1043_v54  ;;  %1064 = vlog2.f32 %v523_v45  ;;  %v510_v17 = vmax.f32 %v496_v53, -100.0  ;;  %v1358_v43 = vmul.f32 %v491_v31, %v1223_v23 }
  0x2c   : > { %689 = vadd.xlane.f32.xlu1 %v688_v7  ;;  %v1047_v62 = vpop.eup %1046  ;;  %v502_v0 = vmul.f32 0.6931472, %v1045_v59  ;;  %1066 = vlog2.f32 %v524_v49  ;;  %v511_v24 = vmax.f32 %v498_v55, -100.0  ;;  %v1482_v49 = vfloor.f32 %v1330_v51 }
  0x2d   : > { %v1049_v15 = vpop.eup %1048  ;;  %v504_v2 = vmul.f32 0.6931472, %v1047_v62  ;;  %v512_v48 = vmax.f32 %v500_v60, -100.0  ;;  %v602_v51 = vfloor.f32 %v1349_v1 }
  0x2e   : > { %v1051_v45 = vpop.eup %1050  ;;  %v506_v10 = vmul.f32 0.6931472, %v1049_v15  ;;  %v513_v54 = vmax.f32 %v502_v0, -100.0  ;;  %v1367_v15 = vadd.f32 %v664_v8, %v1482_v49  ;;  %v550_v0 = vmul.f32 %v510_v17, %v1195_v4 }
  0x2f   : > { %v1053_v12 = vpop.eup %1052  ;;  %v508_v7 = vmul.f32 0.6931472, %v1051_v45  ;;  %v514_v59 = vmax.f32 %v504_v2, -100.0  ;;  %v549_v45 = vmul.f32 %v509_v42, %v1193_v3  ;;  %v551_v62 = vmul.f32 %v511_v24, %v1197_v5 }
  0x30   : > { %v1055_v63 = vpop.eup %1054  ;;  %v515_v13 = vmax.f32 %v506_v10, -100.0  ;;  %v526_v53 = vmul.f32 0.6931472, %v1053_v12  ;;  %v552_v10 = vmul.f32 %v512_v48, %v1199_v6 }
  0x31   : > { %v1057_v55 = vpop.eup %1056  ;;  %v516_v60 = vmax.f32 %v508_v7, -100.0  ;;  %v528_v58 = vmul.f32 0.6931472, %v1055_v63  ;;  %v553_v7 = vmul.f32 %v513_v54, %v1205_v9  ;;  %v554_v63 = vmul.f32 %v514_v59, %v1213_v16 }
  0x32   : > { %v1059_v2 = vpop.eup %1058  ;;  %v530_v37 = vmul.f32 0.6931472, %v1057_v55  ;;  %v541_v52 = vmax.f32 %v526_v53, -100.0  ;;  %v555_v55 = vmul.f32 %v515_v13, %v1223_v23 }
  0x33   : > { %v1061_v12 = vpop.eup %1060  ;;  %v532_v8 = vmul.f32 0.6931472, %v1059_v2  ;;  %v542_v31 = vmax.f32 %v528_v58, -100.0  ;;  %v556_v57 = vmul.f32 %v516_v60, %v1256_v30 }
  0x34   : > { %v1063_v42 = vpop.eup %1062  ;;  %v534_v49 = vmul.f32 0.6931472, %v1061_v12  ;;  %v543_v17 = vmax.f32 %v530_v37, -100.0  ;;  %v565_v24 = vmul.f32 %v557_v19, %v541_v52 }
  0x35   : > { %v1065_v53 = vpop.eup %1064  ;;  %v536_v48 = vmul.f32 0.6931472, %v1063_v42  ;;  %v544_v47 = vmax.f32 %v532_v8, -100.0  ;;  %v566_v58 = vmul.f32 %v558_v20, %v542_v31  ;;  %v1493_v42 = vfloor.f32 %v1290_v46 }
  0x36   : > { %v1067_v2 = vpop.eup %1066  ;;  %v538_v54 = vmul.f32 0.6931472, %v1065_v53  ;;  %v545_v59 = vmax.f32 %v534_v49, -100.0  ;;  %v567_v37 = vmul.f32 %v559_v21, %v543_v17  ;;  %v573_v12 = vadd.f32 %v565_v24, %v549_v45 }
  0x37   : > { %v540_v13 = vmul.f32 0.6931472, %v1067_v2  ;;  %v546_v41 = vmax.f32 %v536_v48, -100.0  ;;  %v568_v3 = vmul.f32 %v560_v22, %v544_v47  ;;  %v574_v19 = vadd.f32 %v566_v58, %v550_v0 }
  0x38   : > { %v547_v52 = vmax.f32 %v538_v54, -100.0  ;;  %v569_v60 = vmul.f32 %v561_v25, %v545_v59  ;;  %v575_v4 = vadd.f32 %v567_v37, %v551_v62  ;;  %v581_v20 = vsub.f32 0.0, %v573_v12 }
  0x39   : > { %v548_v5 = vmax.f32 %v540_v13, -100.0  ;;  %v570_v21 = vmul.f32 %v562_v32, %v546_v41  ;;  %v576_v49 = vadd.f32 %v568_v3, %v552_v10  ;;  %v582_v6 = vsub.f32 0.0, %v574_v19 }
  0x3a   : > { %v571_v22 = vmul.f32 %v563_v38, %v547_v52  ;;  %v577_v9 = vadd.f32 %v569_v60, %v553_v7  ;;  %v583_v25 = vsub.f32 0.0, %v575_v4  ;;  %v621_v47 = vmul.f32 %v613_v34, %v581_v20 }
  0x3b   : > { %v572_v62 = vmul.f32 %v564_v44, %v548_v5  ;;  %v578_v31 = vadd.f32 %v570_v21, %v554_v63  ;;  %v584_v45 = vsub.f32 0.0, %v576_v49  ;;  %v622_v16 = vmul.f32 %v614_v35, %v582_v6 }
  0x3c   : > { %v579_v32 = vadd.f32 %v571_v22, %v555_v55  ;;  %v585_v41 = vsub.f32 0.0, %v577_v9  ;;  %v623_v23 = vmul.f32 %v615_v36, %v583_v25  ;;  %629 = vst [vmem:[%s1393_s7] sm:$0xff] %v621_v47  ;;  %v637_v26 = vmul.f32 %v597_v56, %v581_v20 }
  0x3d   : > { %v580_v34 = vadd.f32 %v572_v62, %v556_v57  ;;  %v586_v38 = vsub.f32 0.0, %v578_v31  ;;  %v1486_v44 = vfloor.f32 %v1249_v29  ;;  %630 = vst [vmem:[%s1393_s7 + $0x8] sm:$0xff] %v622_v16  ;;  %v638_v35 = vmul.f32 %v1487_v27, %v582_v6 }
  0x3e   : > { %v587_v10 = vsub.f32 0.0, %v579_v32  ;;  %v625_v36 = vmul.f32 %v1488_v28, %v585_v41  ;;  %631 = vst [vmem:[%s1393_s7 + $0x10] sm:$0xff] %v623_v23  ;;  %v639_v56 = vmul.f32 %v1489_v11, %v583_v25  ;;  %v1490_v57 = vfloor.f32 %v1339_v14 }
  0x3f   : > { %v624_v0 = vmul.f32 %v1486_v44, %v584_v45  ;;  %v588_v29 = vsub.f32 0.0, %v580_v34  ;;  %v1491_v7 = vfloor.f32 %v1276_v40  ;;  %v1492_v63 = vunpack.c.h.bf16 %v1217_v18 }
  0x40   : > { %v666_v8 = vadd.f32 %v1367_v15, %v1490_v57  ;;  %v627_v17 = vmul.f32 %v1493_v42, %v587_v10  ;;  %633 = vst [vmem:[%s1393_s7 + $0x20] sm:$0xff] %v625_v36  ;;  %v1494_v55 = vmov %v1490_v57  ;;  %v645_v15 = vadd.f32 %v638_v35, %v637_v26 }
  0x41   : > { %v626_v39 = vmul.f32 %v1491_v7, %v586_v38  ;;  %632 = vst [vmem:[%s1393_s7 + $0x18] sm:$0xff] %v624_v0  ;;  %v596_v33 = vmul.f32 %v1492_v63, %v1256_v30  ;;  %v640_v24 = vmul.f32 %v1494_v55, %v584_v45  ;;  %v1495_v53 = vfloor.f32 %v1300_v50 }
  0x42   : > { %635 = vst [vmem:[%s1393_s7 + $0x30] sm:$0xff] %v627_v17  ;;  %v603_v48 = vfloor.f32 %v1358_v43  ;;  %v1496_v18 = vfloor.f32 %v1344_v61  ;;  %v646_v58 = vadd.f32 %v645_v15, %v639_v56  ;;  %v642_v54 = vmul.f32 %v602_v51, %v586_v38 }
  0x43   : > { %v628_v40 = vmul.f32 %v1495_v53, %v588_v29  ;;  %634 = vst [vmem:[%s1393_s7 + $0x28] sm:$0xff] %v626_v39  ;;  %v604_v1 = vfloor.f32 %v596_v33 }
  0x44   : > { %v641_v30 = vmul.f32 %v1496_v18, %v585_v41  ;;  %v1497_v46 = vmov %v1496_v18  ;;  %v647_v14 = vadd.f32 %v646_v58, %v640_v24  ;;  %v643_v59 = vmul.f32 %v603_v48, %v587_v10 }
  0x45   : > { %v667_v2 = vadd.f32 %v666_v8, %v1497_v46  ;;  %636 = vst [vmem:[%s1393_s7 + $0x38] sm:$0xff] %v628_v40  ;;  %v644_v50 = vmul.f32 %v604_v1, %v588_v29 }
  0x46   : > { %v648_v37 = vadd.f32 %v647_v14, %v641_v30 }
  0x47   : > { %v668_v12 = vadd.f32 %v667_v2, %v602_v51 }
  0x48   : > { %v649_v13 = vadd.f32 %v648_v37, %v642_v54 }
  0x49   : > { %v669_v19 = vadd.f32 %v668_v12, %v603_v48 }
  0x4a   : > { %v650_v3 = vadd.f32 %v649_v13, %v643_v59 }
  0x4b   : > { %v670_v43 = vadd.f32 %v669_v19, %v604_v1 }
  0x4c   : > { %v651_v52 = vadd.f32 %v650_v3, %v644_v50 }
  0x4e   : > { %652 = vadd.xlane.f32.xlu0 %v651_v52 }
  0x52   : > { %671 = vadd.xlane.f32.xlu0 %v670_v43 }
  0xb9   : > { %v690_v60 = vpop.xlane.xlu1 %689 }
  0xba   : > { %v691_v4 = vrot.slane %v690_v60, 4 }
  0xbc   : > { %v692_v20 = vadd.f32 %v691_v4, %v690_v60 }
  0xbe   : > { %v693_v49 = vrot.slane %v692_v20, 2 }
  0xc0   : > { %v694_v62 = vadd.f32 %v693_v49, %v692_v20 }
  0xc2   : > { %v695_v41 = vrot.slane %v694_v62, 1 }
  0xc4   : > { %v696_v34 = vadd.f32 %v695_v41, %v694_v62 }
  0xdb   : > { %v653_v61 = vpop.xlane.xlu0 %652 }
  0xdc   : > { %v654_v5 = vrot.slane %v653_v61, 4 }
  0xde   : > { %v655_v21 = vadd.f32 %v654_v5, %v653_v61 }
  0xdf   : > { %v672_v6 = vpop.xlane.xlu0 %671 }
  0xe0   : > { %v656_v22 = vrot.slane %v655_v21, 2  ;;  %v673_v9 = vrot.slane %v672_v6, 4 }
  0xe2   : > { %v674_v25 = vadd.f32 %v673_v9, %v672_v6  ;;  %v657_v47 = vadd.f32 %v656_v22, %v655_v21 }
  0xe4   : > { %v675_v31 = vrot.slane %v674_v25, 2  ;;  %v658_v45 = vrot.slane %v657_v47, 1 }
  0xe6   : > { %v676_v16 = vadd.f32 %v675_v31, %v674_v25  ;;  %v659_v32 = vadd.f32 %v658_v45, %v657_v47 }
  0xe8   : > { %990 = vpush %v659_v32  ;;  %v677_v23 = vrot.slane %v676_v16, 1 }
  0xea   : > { %v678_v26 = vadd.f32 %v677_v23, %v676_v16 }
  0xec   : > { %992 = vpush %v678_v26 }
  0xed   : > { %994 = vpush %v696_v34 }
 0x119   : > { %s991_s13 = spop %990 }
 0x11a   : > { %v661_v38 = vstv %s991_s13 }
 0x11b   : > { %663 = vst.msk [vmem:[%s439_s12] sm:$0x1] %vm662_vm0, %v661_v38 }
 0x11d   : > { %s993_s17 = spop %992 }
 0x11e   : > { %v680_v44 = vstv %s993_s17  ;;  %s995_s21 = spop %994 }
 0x11f   : > { %681 = vst.msk [vmem:[%s448_s16] sm:$0x1] %vm662_vm0, %v680_v44  ;;  %v698_v0 = vstv %s995_s21 }
 0x120   : > { %699 = vst.msk [vmem:[%s457_s22] sm:$0x1] %vm662_vm0, %v698_v0 }
 0x121 PF: > { %s17_s25 = sadd.s32 1, %s1106_s25   ;;  %s1498_s21 = smov %s1098_s23 }
 0x122   : > { %p14_p8 = scmp.ge.s32.totalorder %s17_s25, 6   ;;  %s1499_s22 = smov %s1102_s24 }
 0x123   : > { %s1500_s23 = smov %s1503_s26  ;;  %s1501_s24 = smov %s1507_s27 }
 0x124   :  { %16 = sbr.rel (!%p14_p8) target bundleno = 3 (0x3), region = 104 }

</bundles_post_ra>
